<compile_context>
chip_gen: v5e
topology: v5e:2x2
jax: 0.10.0
libtpu: 0.0.40
codegen_flags: <defaults>
</compile_context>

<pallas_src>
import jax
import jax.numpy as jnp
from jax.experimental import pallas as pl
from jax.experimental.pallas import tpu as pltpu


def _se_kernel(x_ref, xse_ref, w1_ref, b1_ref, w2_ref, b2_ref, o_ref):
    """One (C, hw_tile) tile of one batch element.

    Channels on the sublane axis, H*W on the lane axis: the 1x1 convs are
    (C,C) @ (C,hw_tile) MXU matmuls and the output store is lane-dense.
    """
    # conv_reduce: W1 @ x_se + b1 (operands in the matmul dtype, f32 accumulate)
    xse = xse_ref[...].astype(w1_ref.dtype)
    h = jnp.dot(w1_ref[...], xse, preferred_element_type=jnp.float32)
    h = jnp.maximum(h + b1_ref[...], 0.0)                       # + bias, ReLU
    # conv_expand: W2 @ h + b2
    g = jnp.dot(w2_ref[...], h.astype(w2_ref.dtype),
                preferred_element_type=jnp.float32)
    g = g + b2_ref[...]
    # Exact sigmoid with a single EUP op: sigmoid(g) = 0.5*tanh(0.5*g) + 0.5
    gate = 0.5 * jnp.tanh(0.5 * g) + 0.5
    if o_ref.dtype == jnp.float32:
        o_ref[...] = x_ref[...] * gate                          # f32 path
    else:
        # bf16/f16 path: cast the gate down once, multiply in the activation
        # dtype (skips the full-tile f32 upcast of x and the f32 downcast).
        o_ref[...] = x_ref[...] * gate.astype(o_ref.dtype)


def _vmem_budget():
    """(tile-sizing budget bytes, vmem_limit ceiling bytes) — generation aware."""
    try:
        cap = pltpu.get_tpu_info().vmem_capacity_bytes
    except Exception:
        cap = 64 << 20                       # assume the smallest (v7x per-TC)
    if cap >= (96 << 20):                    # v5e / v6e: 128 MiB VMEM
        return 56 << 20, 100 << 20
    # v7x: 64 MiB per TensorCore; leave headroom for Mosaic internal scratch.
    return 26 << 20, 50 << 20


def _pick_hw_tile(HW, C, x_itemsize, w_itemsize, budget_bytes):
    """Largest lane tile (multiple of 128) such that pipeline buffers, resident
    weights, AND the in-kernel f32 intermediates fit in the VMEM budget."""
    # Resident weights + biases (counted double-buffered: conservative even if
    # the single-buffer request is honoured).
    weight_res = 2 * 2 * C * C * w_itemsize + 2 * 2 * C * 4
    avail = max(budget_bytes - weight_res, 4 << 20)
    # Per hw lane: 3 streams (x, x_se, out) double-buffered in the activation
    # dtype + ~4 f32 full-tile intermediates (h, g, gate, product) in the body.
    bytes_per_lane = 6 * C * x_itemsize + 4 * C * 4
    t = avail // bytes_per_lane
    # Byte-based per-tile cap (~4 MiB per input tile) instead of a fixed lane
    # cap, so small-C shapes still get large tiles (avoid grid-step overhead).
    t = min(t, (4 << 20) // max(C * x_itemsize, 1))
    t = max((t // 128) * 128, 128)
    if HW <= t:
        return HW                            # full-extent block
    return int(t)


def se_layer_pallas(x, x_se, w1, b1, w2, b2, *, hw_tile=None, interpret=False):
    """x, x_se: (B, C, H, W) NCHW.  w1, w2: (C_out, C_in) squeezed 1x1 conv
    weights.  b1, b2: (C,).  Returns (B, C, H, W)."""
    B, C, H, W = x.shape
    assert x_se.shape == x.shape
    HW = H * W

    # NCHW viewed as (B, C, H*W): contiguous reshape, no transpose, no pad.
    xr = x.reshape(B, C, HW)
    sr = x_se.reshape(B, C, HW)

    # Matmul operand dtype: keep the activation dtype, except for large-C f32
    # models where bf16 operands (f32 accumulation) recover MXU throughput.
    act_dtype = x_se.dtype
    if act_dtype == jnp.float32 and C >= 512:
        mx_dtype = jnp.bfloat16
    else:
        mx_dtype = act_dtype
    w1c = w1.astype(mx_dtype)
    w2c = w2.astype(mx_dtype)
    b1c = b1.reshape(C, 1).astype(jnp.float32)
    b2c = b2.reshape(C, 1).astype(jnp.float32)

    budget, limit_cap = _vmem_budget()
    if hw_tile is None:
        hw_tile = _pick_hw_tile(HW, C, x.dtype.itemsize, w1c.dtype.itemsize,
                                budget)
    n_hw = pl.cdiv(HW, hw_tile)

    # Explicit VMEM ceiling: pipeline buffers + f32 intermediates + weights.
    tile = C * hw_tile
    est = (6 * tile * x.dtype.itemsize        # x, x_se, out double-buffered
           + 4 * tile * 4                     # f32 intermediates in the body
           + 4 * C * C * w1c.dtype.itemsize   # weights (conservative 2x)
           + 8 * C * 4)                       # biases
    # 32 MiB floor (v5e scoped default is only 16 MiB), generation-aware cap.
    vmem_limit = int(min(max(2 * est, 32 << 20), limit_cap))

    # Put the larger parallel axis first so the v7x 2-TC megacore split always
    # has granularity (B is often 1-2; spatial tiles usually dominate).
    if n_hw >= B:
        grid = (n_hw, B)
        xmap = lambda j, b: (b, 0, j)
    else:
        grid = (B, n_hw)
        xmap = lambda b, j: (b, 0, j)
    wmap = lambda *_: (0, 0)

    def build(single_buffer_weights):
        wkw = (dict(pipeline_mode=pl.Buffered(1))
               if single_buffer_weights else {})
        return pl.pallas_call(
            _se_kernel,
            out_shape=jax.ShapeDtypeStruct((B, C, HW), x.dtype),
            grid_spec=pltpu.PrefetchScalarGridSpec(
                num_scalar_prefetch=0,
                grid=grid,
                in_specs=[
                    pl.BlockSpec((None, C, hw_tile), xmap),        # x
                    pl.BlockSpec((None, C, hw_tile), xmap),        # x_se
                    pl.BlockSpec((C, C), wmap, **wkw),             # w1
                    pl.BlockSpec((C, 1), wmap, **wkw),             # b1
                    pl.BlockSpec((C, C), wmap, **wkw),             # w2
                    pl.BlockSpec((C, 1), wmap, **wkw),             # b2
                ],
                out_specs=pl.BlockSpec((None, C, hw_tile), xmap),
            ),
            compiler_params=pltpu.CompilerParams(
                dimension_semantics=("parallel", "parallel"),
                vmem_limit_bytes=vmem_limit),
            interpret=interpret,
        )

    try:
        # Grid-invariant weights/biases single-buffered: frees 2*C*C*itemsize
        # VMEM for a larger hw tile (matters most for large C on v7x).
        out = build(True)(xr, sr, w1c, b1c, w2c, b2c)
    except Exception:
        # pipeline_mode not supported by this jax build: default buffering.
        out = build(False)(xr, sr, w1c, b1c, w2c, b2c)

    return out.reshape(B, C, H, W)


def se_layer_ref(x, x_se, w1, b1, w2, b2):
    """Pure-JAX reference matching the PyTorch module (NCHW)."""
    h = jnp.einsum('oc,bchw->bohw', w1, x_se) + b1[None, :, None, None]
    h = jnp.maximum(h, 0.0)
    g = jnp.einsum('oc,bchw->bohw', w2, h) + b2[None, :, None, None]
    return x * jax.nn.sigmoid(g)


if __name__ == "__main__":
    key = jax.random.PRNGKey(0)

    def run_case(B, C, H, W, hw_tile=None, seed_offset=0):
        ks = jax.random.split(jax.random.fold_in(key, seed_offset), 6)
        x = jax.random.normal(ks[0], (B, C, H, W), dtype=jnp.float32)
        x_se = jax.random.normal(ks[1], (B, C, H, W), dtype=jnp.float32)
        # Conv2d(C, C, 1) weights squeezed to (C, C) plus biases.
        w1 = 0.3 * jax.random.normal(ks[2], (C, C), dtype=jnp.float32)
        b1 = 0.1 * jax.random.normal(ks[3], (C,), dtype=jnp.float32)
        w2 = 0.3 * jax.random.normal(ks[4], (C, C), dtype=jnp.float32)
        b2 = 0.1 * jax.random.normal(ks[5], (C,), dtype=jnp.float32)

        out = se_layer_pallas(x, x_se, w1, b1, w2, b2, hw_tile=hw_tile)
        out = jax.block_until_ready(out)
        ref = se_layer_ref(x, x_se, w1, b1, w2, b2)
        assert out.shape == (B, C, H, W)
        # Gate is now exact (tanh form); remaining slack covers default-precision
        # MXU matmul differences vs. the einsum reference.
        assert jnp.allclose(out, ref, atol=1e-3, rtol=1e-3), \
            f"mismatch vs reference for case {(B, C, H, W)}"

    # Small case matching the module spec (single lane-dense tile per batch).
    run_case(2, 4, 16, 16)
    # Larger C, multi-tile grid, H*W not divisible by the tile (ragged path).
    run_case(1, 32, 10, 30, hw_tile=128, seed_offset=1)

    print("KERNEL_OK")
</pallas_src>

<mosaic_0001>
module attributes {stable_mosaic.version = 11 : i64} {
  func.func @_se_kernel(%arg0: i32, %arg1: i32, %arg2: memref<1x4x256xf32, #tpu.memory_space<vmem>>, %arg3: memref<1x4x256xf32, #tpu.memory_space<vmem>>, %arg4: memref<4x4xf32, #tpu.memory_space<vmem>>, %arg5: memref<4x1xf32, #tpu.memory_space<vmem>>, %arg6: memref<4x4xf32, #tpu.memory_space<vmem>>, %arg7: memref<4x1xf32, #tpu.memory_space<vmem>>, %arg8: memref<1x4x256xf32, #tpu.memory_space<vmem>>) attributes {dimension_semantics = [#tpu.dimension_semantics<parallel>, #tpu.dimension_semantics<parallel>], iteration_bounds = array<i64: 2, 1>, scalar_prefetch = 0 : i64, scratch_operands = 0 : i64, tpu.core_type = #tpu.core_type<tc>, window_params = [{transform_indices = @transform_0, window_bounds = array<i64: 1, 4, 256>}, {transform_indices = @transform_1, window_bounds = array<i64: 1, 4, 256>}, {pipeline_mode = #tpu.pipeline_mode<synchronous>, transform_indices = @transform_2, window_bounds = array<i64: 4, 4>}, {pipeline_mode = #tpu.pipeline_mode<synchronous>, transform_indices = @transform_3, window_bounds = array<i64: 4, 1>}, {pipeline_mode = #tpu.pipeline_mode<synchronous>, transform_indices = @transform_4, window_bounds = array<i64: 4, 4>}, {pipeline_mode = #tpu.pipeline_mode<synchronous>, transform_indices = @transform_5, window_bounds = array<i64: 4, 1>}, {transform_indices = @transform_6, window_bounds = array<i64: 1, 4, 256>}]} {
    %c0 = arith.constant 0 : index
    %c0_0 = arith.constant 0 : index
    %c0_1 = arith.constant 0 : index
    %0 = vector.load %arg3[%c0, %c0_0, %c0_1] : memref<1x4x256xf32, #tpu.memory_space<vmem>>, vector<1x4x256xf32>
    %1 = vector.shape_cast %0 : vector<1x4x256xf32> to vector<4x256xf32>
    %c0_2 = arith.constant 0 : index
    %c0_3 = arith.constant 0 : index
    %2 = vector.load %arg4[%c0_2, %c0_3] : memref<4x4xf32, #tpu.memory_space<vmem>>, vector<4x4xf32>
    %cst = arith.constant dense<0.000000e+00> : vector<4x256xf32>
    %3 = tpu.matmul %2, %1, %cst {dimension_numbers = #tpu.dot_dimension_numbers<[1], [0], [0], [1], [0, 0, 1, 1], [], []>} : vector<4x4xf32>, vector<4x256xf32>, vector<4x256xf32> -> vector<4x256xf32>
    %c0_4 = arith.constant 0 : index
    %c0_5 = arith.constant 0 : index
    %4 = vector.load %arg5[%c0_4, %c0_5] : memref<4x1xf32, #tpu.memory_space<vmem>>, vector<4x1xf32>
    %5 = vector.broadcast %4 : vector<4x1xf32> to vector<4x256xf32>
    %6 = arith.addf %3, %5 : vector<4x256xf32>
    %cst_6 = arith.constant 0.000000e+00 : f32
    %7 = vector.broadcast %cst_6 : f32 to vector<4x256xf32>
    %8 = arith.maximumf %6, %7 : vector<4x256xf32>
    %c0_7 = arith.constant 0 : index
    %c0_8 = arith.constant 0 : index
    %9 = vector.load %arg6[%c0_7, %c0_8] : memref<4x4xf32, #tpu.memory_space<vmem>>, vector<4x4xf32>
    %cst_9 = arith.constant dense<0.000000e+00> : vector<4x256xf32>
    %10 = tpu.matmul %9, %8, %cst_9 {dimension_numbers = #tpu.dot_dimension_numbers<[1], [0], [0], [1], [0, 0, 1, 1], [], []>} : vector<4x4xf32>, vector<4x256xf32>, vector<4x256xf32> -> vector<4x256xf32>
    %c0_10 = arith.constant 0 : index
    %c0_11 = arith.constant 0 : index
    %11 = vector.load %arg7[%c0_10, %c0_11] : memref<4x1xf32, #tpu.memory_space<vmem>>, vector<4x1xf32>
    %12 = vector.broadcast %11 : vector<4x1xf32> to vector<4x256xf32>
    %13 = arith.addf %10, %12 : vector<4x256xf32>
    %cst_12 = arith.constant 5.000000e-01 : f32
    %14 = vector.broadcast %cst_12 : f32 to vector<4x256xf32>
    %15 = arith.mulf %14, %13 : vector<4x256xf32>
    %16 = math.tanh %15 : vector<4x256xf32>
    %cst_13 = arith.constant 5.000000e-01 : f32
    %17 = vector.broadcast %cst_13 : f32 to vector<4x256xf32>
    %18 = arith.mulf %17, %16 : vector<4x256xf32>
    %cst_14 = arith.constant 5.000000e-01 : f32
    %19 = vector.broadcast %cst_14 : f32 to vector<4x256xf32>
    %20 = arith.addf %18, %19 : vector<4x256xf32>
    %c0_15 = arith.constant 0 : index
    %c0_16 = arith.constant 0 : index
    %c0_17 = arith.constant 0 : index
    %21 = vector.load %arg2[%c0_15, %c0_16, %c0_17] : memref<1x4x256xf32, #tpu.memory_space<vmem>>, vector<1x4x256xf32>
    %22 = vector.shape_cast %21 : vector<1x4x256xf32> to vector<4x256xf32>
    %23 = arith.mulf %22, %20 : vector<4x256xf32>
    %c0_18 = arith.constant 0 : index
    %c0_19 = arith.constant 0 : index
    %c0_20 = arith.constant 0 : index
    %24 = vector.load %arg8[%c0_18, %c0_19, %c0_20] : memref<1x4x256xf32, #tpu.memory_space<vmem>>, vector<1x4x256xf32>
    %25 = vector.shape_cast %24 : vector<1x4x256xf32> to vector<4x256xf32>
    %26 = vector.shape_cast %23 : vector<4x256xf32> to vector<1x4x256xf32>
    tpu.vector_store %arg8[%c0_18, %c0_19, %c0_20], %26 {strides = array<i32>} : memref<1x4x256xf32, #tpu.memory_space<vmem>>, vector<1x4x256xf32>,
    return
  }
  func.func @transform_0(%arg0: i32, %arg1: i32) -> (i32, i32, i32) {
    %c0_i32 = arith.constant 0 : i32
    %c0_i32_0 = arith.constant 0 : i32
    return %arg0, %c0_i32, %arg1 : i32, i32, i32
  }
  func.func @transform_1(%arg0: i32, %arg1: i32) -> (i32, i32, i32) {
    %c0_i32 = arith.constant 0 : i32
    %c0_i32_0 = arith.constant 0 : i32
    return %arg0, %c0_i32, %arg1 : i32, i32, i32
  }
  func.func @transform_2(%arg0: i32, %arg1: i32) -> (i32, i32) {
    %c0_i32 = arith.constant 0 : i32
    %c0_i32_0 = arith.constant 0 : i32
    %c0_i32_1 = arith.constant 0 : i32
    return %c0_i32, %c0_i32_0 : i32, i32
  }
  func.func @transform_3(%arg0: i32, %arg1: i32) -> (i32, i32) {
    %c0_i32 = arith.constant 0 : i32
    %c0_i32_0 = arith.constant 0 : i32
    %c0_i32_1 = arith.constant 0 : i32
    return %c0_i32, %c0_i32_0 : i32, i32
  }
  func.func @transform_4(%arg0: i32, %arg1: i32) -> (i32, i32) {
    %c0_i32 = arith.constant 0 : i32
    %c0_i32_0 = arith.constant 0 : i32
    %c0_i32_1 = arith.constant 0 : i32
    return %c0_i32, %c0_i32_0 : i32, i32
  }
  func.func @transform_5(%arg0: i32, %arg1: i32) -> (i32, i32) {
    %c0_i32 = arith.constant 0 : i32
    %c0_i32_0 = arith.constant 0 : i32
    %c0_i32_1 = arith.constant 0 : i32
    return %c0_i32, %c0_i32_0 : i32, i32
  }
  func.func @transform_6(%arg0: i32, %arg1: i32) -> (i32, i32, i32) {
    %c0_i32 = arith.constant 0 : i32
    %c0_i32_0 = arith.constant 0 : i32
    return %arg0, %c0_i32, %arg1 : i32, i32, i32
  }
}

module attributes {stable_mosaic.version = 11 : i64} {
  func.func @_se_kernel(%arg0: i32, %arg1: i32, %arg2: memref<1x4x256xf32, #tpu.memory_space<vmem>>, %arg3: memref<1x4x256xf32, #tpu.memory_space<vmem>>, %arg4: memref<4x4xf32, #tpu.memory_space<vmem>>, %arg5: memref<4x1xf32, #tpu.memory_space<vmem>>, %arg6: memref<4x4xf32, #tpu.memory_space<vmem>>, %arg7: memref<4x1xf32, #tpu.memory_space<vmem>>, %arg8: memref<1x4x256xf32, #tpu.memory_space<vmem>>) attributes {dimension_semantics = [#tpu.dimension_semantics<parallel>, #tpu.dimension_semantics<parallel>], iteration_bounds = array<i64: 2, 1>, scalar_prefetch = 0 : i64, scratch_operands = 0 : i64, tpu.core_type = #tpu.core_type<tc>, window_params = [{transform_indices = @transform_0, window_bounds = array<i64: 1, 4, 256>}, {transform_indices = @transform_1, window_bounds = array<i64: 1, 4, 256>}, {pipeline_mode = #tpu.pipeline_mode<synchronous>, transform_indices = @transform_2, window_bounds = array<i64: 4, 4>}, {pipeline_mode = #tpu.pipeline_mode<synchronous>, transform_indices = @transform_3, window_bounds = array<i64: 4, 1>}, {pipeline_mode = #tpu.pipeline_mode<synchronous>, transform_indices = @transform_4, window_bounds = array<i64: 4, 4>}, {pipeline_mode = #tpu.pipeline_mode<synchronous>, transform_indices = @transform_5, window_bounds = array<i64: 4, 1>}, {transform_indices = @transform_6, window_bounds = array<i64: 1, 4, 256>}]} {
    %c0 = arith.constant 0 : index
    %c0_0 = arith.constant 0 : index
    %c0_1 = arith.constant 0 : index
    %0 = vector.load %arg3[%c0, %c0_0, %c0_1] : memref<1x4x256xf32, #tpu.memory_space<vmem>>, vector<1x4x256xf32>
    %1 = vector.shape_cast %0 : vector<1x4x256xf32> to vector<4x256xf32>
    %c0_2 = arith.constant 0 : index
    %c0_3 = arith.constant 0 : index
    %2 = vector.load %arg4[%c0_2, %c0_3] : memref<4x4xf32, #tpu.memory_space<vmem>>, vector<4x4xf32>
    %cst = arith.constant dense<0.000000e+00> : vector<4x256xf32>
    %3 = tpu.matmul %2, %1, %cst {dimension_numbers = #tpu.dot_dimension_numbers<[1], [0], [0], [1], [0, 0, 1, 1], [], []>} : vector<4x4xf32>, vector<4x256xf32>, vector<4x256xf32> -> vector<4x256xf32>
    %c0_4 = arith.constant 0 : index
    %c0_5 = arith.constant 0 : index
    %4 = vector.load %arg5[%c0_4, %c0_5] : memref<4x1xf32, #tpu.memory_space<vmem>>, vector<4x1xf32>
    %5 = vector.broadcast %4 : vector<4x1xf32> to vector<4x256xf32>
    %6 = arith.addf %3, %5 : vector<4x256xf32>
    %cst_6 = arith.constant 0.000000e+00 : f32
    %7 = vector.broadcast %cst_6 : f32 to vector<4x256xf32>
    %8 = arith.maximumf %6, %7 : vector<4x256xf32>
    %c0_7 = arith.constant 0 : index
    %c0_8 = arith.constant 0 : index
    %9 = vector.load %arg6[%c0_7, %c0_8] : memref<4x4xf32, #tpu.memory_space<vmem>>, vector<4x4xf32>
    %cst_9 = arith.constant dense<0.000000e+00> : vector<4x256xf32>
    %10 = tpu.matmul %9, %8, %cst_9 {dimension_numbers = #tpu.dot_dimension_numbers<[1], [0], [0], [1], [0, 0, 1, 1], [], []>} : vector<4x4xf32>, vector<4x256xf32>, vector<4x256xf32> -> vector<4x256xf32>
    %c0_10 = arith.constant 0 : index
    %c0_11 = arith.constant 0 : index
    %11 = vector.load %arg7[%c0_10, %c0_11] : memref<4x1xf32, #tpu.memory_space<vmem>>, vector<4x1xf32>
    %12 = vector.broadcast %11 : vector<4x1xf32> to vector<4x256xf32>
    %13 = arith.addf %10, %12 : vector<4x256xf32>
    %cst_12 = arith.constant 5.000000e-01 : f32
    %14 = vector.broadcast %cst_12 : f32 to vector<4x256xf32>
    %15 = arith.mulf %14, %13 : vector<4x256xf32>
    %16 = math.tanh %15 : vector<4x256xf32>
    %cst_13 = arith.constant 5.000000e-01 : f32
    %17 = vector.broadcast %cst_13 : f32 to vector<4x256xf32>
    %18 = arith.mulf %17, %16 : vector<4x256xf32>
    %cst_14 = arith.constant 5.000000e-01 : f32
    %19 = vector.broadcast %cst_14 : f32 to vector<4x256xf32>
    %20 = arith.addf %18, %19 : vector<4x256xf32>
    %c0_15 = arith.constant 0 : index
    %c0_16 = arith.constant 0 : index
    %c0_17 = arith.constant 0 : index
    %21 = vector.load %arg2[%c0_15, %c0_16, %c0_17] : memref<1x4x256xf32, #tpu.memory_space<vmem>>, vector<1x4x256xf32>
    %22 = vector.shape_cast %21 : vector<1x4x256xf32> to vector<4x256xf32>
    %23 = arith.mulf %22, %20 : vector<4x256xf32>
    %c0_18 = arith.constant 0 : index
    %c0_19 = arith.constant 0 : index
    %c0_20 = arith.constant 0 : index
    %24 = vector.load %arg8[%c0_18, %c0_19, %c0_20] : memref<1x4x256xf32, #tpu.memory_space<vmem>>, vector<1x4x256xf32>
    %25 = vector.shape_cast %24 : vector<1x4x256xf32> to vector<4x256xf32>
    %26 = vector.shape_cast %23 : vector<4x256xf32> to vector<1x4x256xf32>
    tpu.vector_store %arg8[%c0_18, %c0_19, %c0_20], %26 {strides = array<i32>} : memref<1x4x256xf32, #tpu.memory_space<vmem>>, vector<1x4x256xf32>,
    return
  }
  func.func @transform_0(%arg0: i32, %arg1: i32) -> (i32, i32, i32) {
    %c0_i32 = arith.constant 0 : i32
    %c0_i32_0 = arith.constant 0 : i32
    return %arg0, %c0_i32, %arg1 : i32, i32, i32
  }
  func.func @transform_1(%arg0: i32, %arg1: i32) -> (i32, i32, i32) {
    %c0_i32 = arith.constant 0 : i32
    %c0_i32_0 = arith.constant 0 : i32
    return %arg0, %c0_i32, %arg1 : i32, i32, i32
  }
  func.func @transform_2(%arg0: i32, %arg1: i32) -> (i32, i32) {
    %c0_i32 = arith.constant 0 : i32
    %c0_i32_0 = arith.constant 0 : i32
    %c0_i32_1 = arith.constant 0 : i32
    return %c0_i32, %c0_i32_0 : i32, i32
  }
  func.func @transform_3(%arg0: i32, %arg1: i32) -> (i32, i32) {
    %c0_i32 = arith.constant 0 : i32
    %c0_i32_0 = arith.constant 0 : i32
    %c0_i32_1 = arith.constant 0 : i32
    return %c0_i32, %c0_i32_0 : i32, i32
  }
  func.func @transform_4(%arg0: i32, %arg1: i32) -> (i32, i32) {
    %c0_i32 = arith.constant 0 : i32
    %c0_i32_0 = arith.constant 0 : i32
    %c0_i32_1 = arith.constant 0 : i32
    return %c0_i32, %c0_i32_0 : i32, i32
  }
  func.func @transform_5(%arg0: i32, %arg1: i32) -> (i32, i32) {
    %c0_i32 = arith.constant 0 : i32
    %c0_i32_0 = arith.constant 0 : i32
    %c0_i32_1 = arith.constant 0 : i32
    return %c0_i32, %c0_i32_0 : i32, i32
  }
  func.func @transform_6(%arg0: i32, %arg1: i32) -> (i32, i32, i32) {
    %c0_i32 = arith.constant 0 : i32
    %c0_i32_0 = arith.constant 0 : i32
    return %arg0, %c0_i32, %arg1 : i32, i32, i32
  }
}

</mosaic_0001>

<bundles_post_ra>
// kernel: tpu_custom_call.1
= control target key start
LH: loop header
LB: loop body
LE: loop exit
PB: predicated region body
PF: predicated region fallthrough
CT: control target
= control target key end

     0   :  { %11 = vsyncpa [#allocation3], 0  ;;  %s1042_s0 = inlined_call_operand.hbm [shape: f32[2,4,256], index: 0, kind: input, shape index: {}]   ;;  %s1043_s1 = inlined_call_operand.hbm [shape: f32[2,4,256], index: 1, kind: input, shape index: {}]   ;;  %s1044_s2 = inlined_call_operand.vmem [shape: f32[4,4], index: 2, kind: input, shape index: {}]   ;;  %s1045_s3 = inlined_call_operand.vmem [shape: f32[4,1], index: 3, kind: input, shape index: {}]   ;;  %s1046_s4 = inlined_call_operand.vmem [shape: f32[4,4], index: 4, kind: input, shape index: {}]   ;;  %s1047_s5 = inlined_call_operand.vmem [shape: f32[4,1], index: 5, kind: input, shape index: {}]   ;;  %s1048_s6 = inlined_call_operand.hbm [shape: f32[2,4,256], index: 6, kind: output, shape index: {}]  }
   0x1   :  { %13 = vsyncpa [#allocation3 + $0x1], 0 }
   0x2   :  { %14 = vsyncpa [#allocation6], 0 }
   0x3   :  { %16 = vsyncpa [#allocation6 + $0x1], 0 }
   0x4   :  { %17 = vsyncpa [#allocation4], 0 }
   0x5   :  { %19 = vsyncpa [#allocation4 + $0x1], 0  ;;  %s886_s21 = smov 0   ;;  %s888_s22 = smov 0  }
   0x6   :  { %s890_s23 = smov 0   ;;  %s892_s24 = smov 0  }
   0x7   :  { %s894_s25 = smov 0   ;;  %s896_s26 = smov 0  }
   0x8 LB: > { %1051 = sst [smem:[#allocation11_spill]] %s844_s25  ;;  %s599_s27 = sadd.s32 4294967295, %s848_s26   ;;  %s848_s26 = sphi %s896_s26, %s25_s26   ;;  %s844_s25 = sphi %s894_s25, %s1060_s25   ;;  %s840_s24 = sphi %s892_s24, %s1059_s24   ;;  %s836_s23 = sphi %s890_s23, %s1063_s23   ;;  %s832_s22 = sphi %s888_s22, %s1062_s22   ;;  %s828_s21 = sphi %s886_s21, %s1061_s21  }
   0x9   : > { %s600_s28 = sadd.s32 4294967294, %s848_s26   ;;  %s37_s29 = sadd.s32 1, %s844_s25 }
   0xa   : > { %s46_s30 = sadd.s32 1, %s836_s23  ;;  %p39_p0 = scmp.ge.s32.totalorder %s37_s29, 2 }
   0xb   : > { %p53_p1 = scmp.ne.s32.totalorder %s836_s23, %s832_s22  ;;  %p54_p2 = scmp.eq.s32.totalorder %s848_s26, 0 }
   0xc   : > { %p59_p3 = scmp.ne.s32.totalorder %s832_s22, %s828_s21  ;;  %s1065_s29 = smov (%p39_p0, %s37_s29), 0 }
   0xd   : > { %1052 = sst [smem:[#allocation12_spill]] %s1065_s29  ;;  %p927_p4 = por %p54_p2, %p53_p1 }
   0xe   : > { %p60_p5 = scmp.eq.s32.totalorder %s599_s27, 0  ;;  %s41_s8 = ssub.s32 %s844_s25, %s1065_s29 }
   0xf   : > { %p197_p6 = scmp.eq.s32.totalorder %s599_s27, 1  ;;  %p44_p7 = scmp.eq.s32.totalorder %s41_s8, 0 }
  0x10   : > { %p933_p8 = por %p60_p5, %p59_p3  ;;  %p203_p10 = scmp.eq.s32.totalorder %s600_s28, 1 }
  0x11   : > { %p937_p9 = por %p197_p6, %p53_p1  ;;  %p602_p12 = scmp.ge.s32.totalorder %s848_s26, 2 }
  0x12   : > { %s942_s11 = scalar_select %p44_p7, %s836_s23, %s46_s30  }
  0x13   : > { %p944_p11 = por %p203_p10, %p59_p3  ;;  %p646_p13 = scmp.lt.s32.totalorder %s848_s26, 2 }
  0x14   : > { %1056 = sst [smem:[#allocation13_spill]] %s942_s11  ;;  %s235_s13 = sand.u32 1, %s836_s23  }
  0x15   : > { %s603_s14 = sshll.u32 %s235_s13, 3  ;;  %s626_s15 = sshll.u32 %s844_s25, 3 }
  0x16   : > { %s246_s18 = scalar_lea.hbm %s1042_s0, %s626_s15  ;;  %s239_s19 = scalar_lea.vmem [#allocation2], %s603_s14 }
  0x17   : > { %s250_s20 = sshll.u32 %s239_s19, 4  ;;  %s248_s27 = sshll.u32 %s246_s18, 4  ;;  %s251_s20 = int_to_ptr.vmem [resolvable:$true] %s250_s20  ;;  %s249_s27 = int_to_ptr.hbm [resolvable:$true] %s248_s27 }
  0x18   : > { %p636_p0 = pnand %p646_p13, %p927_p4  ;;  %p609_p1 = scmp.ge.s32.totalorder %s848_s26, 1 }
  0x19   : > { %p277_p2 = scmp.lt.s32.totalorder %s848_s26, 3  ;;  %s236_s28 = scalar_lea.sflag [#allocation3], %s235_s13 }
  0x1a   : > { %638 = dma.hbm_to_vmem [thread:$0]  (!%p636_p0), %s249_s27, 128, %s251_s20, %s236_s28  }
  0x1b   : > { %p278_p3 = pnand %p609_p1, %p277_p2  ;;  %s268_s29 = scalar_lea.hbm %s1043_s1, %s626_s15 }
  0x1c   : > { %s261_s25 = scalar_lea.vmem [#allocation5], %s603_s14  ;;  %s270_s16 = sshll.u32 %s268_s29, 4  ;;  %s271_s16 = int_to_ptr.hbm [resolvable:$true] %s270_s16 }
  0x1d   : > { %s272_s11 = sshll.u32 %s261_s25, 4  ;;  %s258_s17 = scalar_lea.sflag [#allocation6], %s235_s13  ;;  %s273_s11 = int_to_ptr.vmem [resolvable:$true] %s272_s11 }
  0x1e   : > { %641 = dma.hbm_to_vmem [thread:$0]  (!%p636_p0), %s271_s16, 128, %s273_s11, %s258_s17  }
  0x1f   : > { %281 = sbr.rel (%p278_p3) target bundleno = 336 (0x150), region = 44  ;;  %s963_s7 = sand.u32 (!%p278_p3), 1, %s832_s22  }
  0x20   : > { %s966_s18 = sshll.u32 (!%p278_p3), %s963_s7, 3  ;;  %s284_s19 = scalar_lea.sflag (!%p278_p3), [#allocation3], %s963_s7 }
  0x21   : > { %s287_s20 = scalar_lea.vmem (!%p278_p3), [#allocation2], %s966_s18 }
  0x24   : > { %815 = dma.done.wait (%p933_p8), %s284_s19, 128  }
  0x25   : > { %817 = vsyncadd (%p933_p8), %s284_s19, 4294967168  ;;  %s294_s25 = scalar_lea.sflag [#allocation6], %s963_s7  ;;  %s297_s29 = scalar_lea.vmem [#allocation5], %s966_s18 }
  0x26   : > { %819 = dma.done.wait (%p933_p8), %s294_s25, 128  }
  0x27   : > { %821 = vsyncadd (%p933_p8), %s294_s25, 4294967168  ;;  %v850_v0 = vmov 0   ;;  %v335_v1 = vld [vmem:[%s297_s29] sm:$0xff]  ;;  %vm351_vm0 = vcmask 1043456   ;;  %vm347_vm1 = vcmask 31744   ;;  %s628_s8 = sshll.u32 %s840_s24, 3 }
  0x28   : > { %697 = vset.pattern.permute.xlu0 %v850_v0  ;;  %v337_v2 = vld [vmem:[%s1045_s3] sm:$0xf]  ;;  %344 = vst [vmem:[#allocation1] ss:$2 sm:$0xff] %v335_v1  ;;  %s484_s19 = scalar_lea.hbm %s1048_s6, %s628_s8  ;;  %v462_v28 = vld [vmem:[%s287_s20] sm:$0xff]  ;;  %s331_s25 = scalar_lea.vmem [#allocation7], %s966_s18 }
  0x29   : > { %340 = vperm.xlu0 %697, %v337_v2   ;;  %v336_v3 = vld [vmem:[%s1044_s2] sm:$0xf]  ;;  %s486_s29 = sshll.u32 %s331_s25, 4  ;;  %s488_s11 = sshll.u32 %s484_s19, 4  ;;  %s487_s29 = int_to_ptr.vmem [resolvable:$true] %s486_s29  ;;  %s489_s11 = int_to_ptr.hbm [resolvable:$true] %s488_s11 }
  0x2a   : > { %v399_v4 = vld [vmem:[%s1047_s5] sm:$0xf]  ;;  %s471_s24 = scalar_lea.sflag [#allocation4], %s963_s7  ;;  %s776_s13 = sshra.s32 %s489_s11, 4  ;;  %s777_s13 = int_to_ptr.hbm [resolvable:$true] %s776_s13 }
  0x2b   : > { %v398_v14 = vld [vmem:[%s1046_s4] sm:$0xf]  ;;  %s778_s14 = scalar_lea.hbm %s777_s13, 8  ;;  %s782_s18 = scalar_lea.hbm %s1048_s6, 16 }
  0x2c   : > { %p779_p4 = scmp.ne.s32.totalorder %s777_s13, %s778_s14  ;;  %p783_p7 = scmp.lt.s32.totalorder %s777_s13, %s1048_s6 }
  0x2d   : > { %p784_p8 = scmp.lt.s32.totalorder %s782_s18, %s778_s14 }
  0x2e   : > { %p780_p5 = pnand %p779_p4, %p937_p9 }
  0x2f   : > { %v345_v5 = vld.sshfl [vmem:[#allocation1] sm:$0xff pattern:$0x75316420]  ;;  %v346_v6 = vld.sshfl [vmem:[#allocation1 + $0x8] sm:$0xff pattern:$0x75316420]  ;;  %p785_p10 = por %p784_p8, %p783_p7 }
  0x30   : > { %613 = vmatpush.msk.msra.mxu0 %vm351_vm0, %v345_v5  ;;  %615 = vmatpush.msk.msra.mxu1 %vm351_vm0, %v346_v6  ;;  %p781_p6 = pneg %p780_p5 }
  0x31   : > { %614 = vmatmul.msk.f32.vlgmr.msra.gmra.mxu0 %vm347_vm1, %v336_v3  ;;  %616 = vmatmul.msk.f32.vlgmr.msra.gmra.mxu1 %vm347_vm1, %v336_v3 }
  0x32   : > { %402 = vperm.xlu0 %697, %v399_v4   ;;  %p786_p13 = pnand %p785_p10, %p781_p6 }
  0x9b   : > { %v341_v7 = vpop.permute.xlu0 %340 }
  0xa4   : > { %v403_v15 = vpop.permute.xlu0 %402 }
  0xae   : > { %v373_v8 = vpop.f32.mrf.mxu0  ;;  %v393_v9 = vpop.f32.mrf.mxu1 }
  0xaf   : > { %v374_v10 = vadd.f32 %v373_v8, %v341_v7  ;;  %v394_v11 = vadd.f32 %v393_v9, %v341_v7 }
  0xb1   : > { %v396_v12 = vmax.f32 %v374_v10, 0.0  ;;  %v397_v13 = vmax.f32 %v394_v11, 0.0 }
  0xb3   : > { %617 = vmatpush.msk.msra.mxu2 %vm351_vm0, %v396_v12  ;;  %619 = vmatpush.msk.msra.mxu3 %vm351_vm0, %v397_v13 }
  0xb4   : > { %618 = vmatmul.msk.f32.vlgmr.msra.gmra.mxu2 %vm347_vm1, %v398_v14  ;;  %620 = vmatmul.msk.f32.vlgmr.msra.gmra.mxu3 %vm347_vm1, %v398_v14 }
 0x137   : > { %v431_v16 = vpop.f32.mrf.mxu2  ;;  %v451_v17 = vpop.f32.mrf.mxu3 }
 0x138   : > { %v432_v18 = vadd.f32 %v431_v16, %v403_v15  ;;  %v452_v19 = vadd.f32 %v451_v17, %v403_v15 }
 0x13a   : > { %v454_v20 = vmul.f32 0.5, %v432_v18  ;;  %v455_v21 = vmul.f32 0.5, %v452_v19 }
 0x13c   : > { %698 = vtanh.f32 %v454_v20 }
 0x13d   : > { %700 = vtanh.f32 %v455_v21 }
 0x142   : > { %v699_v22 = vpop.eup %698 }
 0x143   : > { %v701_v23 = vpop.eup %700  ;;  %v458_v24 = vmul.f32 0.5, %v699_v22 }
 0x144   : > { %v459_v25 = vmul.f32 0.5, %v701_v23 }
 0x145   : > { %v460_v27 = vadd.f32 0.5, %v458_v24 }
 0x146   : > { %v461_v26 = vadd.f32 0.5, %v459_v25 }
 0x148   : > { %v465_v29 = vrot.slane %v461_v26, 4 }
 0x14a   : > { %v466_v30 = vsel %vm351_vm0, %v460_v27, %v465_v29 }
 0x14b   : > { %v468_v31 = vmul.f32 %v466_v30, %v462_v28 }
 0x14d   : > { %469 = vst [vmem:[%s331_s25] sm:$0xff] %v468_v31 }
 0x14e   : > { %789 = shalt.err (!%p786_p13)
}
 0x14f   : > { %633 = dma.vmem_to_hbm [thread:$0]  (%p937_p9), %s487_s29, 128, %s489_s11, %s471_s24  }
 0x150 PF: > { %s500_s7 = sand.u32 1, %s828_s21   ;;  %p643_p0 = pnand %p602_p12, %p944_p11 }
 0x151   : > { %s501_s9 = scalar_lea.sflag [#allocation4], %s500_s7 }
 0x152   : > { %p644_p1 = pneg %p643_p0 }
 0x154   : > { %823 = dma.done.wait (%p644_p1), %s501_s9, 128  }
 0x155   : > { %825 = vsyncadd (%p644_p1), %s501_s9, 4294967168  ;;  %s25_s26 = sadd.s32 1, %s848_s26   ;;  %s1058_s30 = sld [smem:[#allocation13_spill]] }
 0x156   : > { %p22_p2 = scmp.ge.s32.totalorder %s25_s26, 4   ;;  %s1059_s24 = sld [smem:[#allocation11_spill]] }
 0x157   : > { %s1060_s25 = sld [smem:[#allocation12_spill]]  ;;  %s1061_s21 = smov %s832_s22 }
 0x158   : > { %s1062_s22 = smov %s836_s23  ;;  %24 = sbr.rel (!%p22_p2) target bundleno = 8 (0x8), region = 102 }
 0x15b   : > { %s1063_s23 = smov %s1058_s30 }
 0x15d   :  { %507 = vsyncpa [#allocation3], 1 }
 0x15e   :  { %509 = vsyncpa [#allocation3 + $0x1], 1 }
 0x15f   :  { %510 = vsyncpa [#allocation6], 1 }
 0x160   :  { %512 = vsyncpa [#allocation6 + $0x1], 1 }
 0x161   :  { %513 = vsyncpa [#allocation4], 1 }
 0x162   :  { %515 = vsyncpa [#allocation4 + $0x1], 1 }

// kernel: tpu_custom_call.1
= control target key start
LH: loop header
LB: loop body
LE: loop exit
PB: predicated region body
PF: predicated region fallthrough
CT: control target
= control target key end

     0   :  { %11 = vsyncpa [#allocation3], 0  ;;  %s1042_s0 = inlined_call_operand.hbm [shape: f32[2,4,256], index: 0, kind: input, shape index: {}]   ;;  %s1043_s1 = inlined_call_operand.hbm [shape: f32[2,4,256], index: 1, kind: input, shape index: {}]   ;;  %s1044_s2 = inlined_call_operand.vmem [shape: f32[4,4], index: 2, kind: input, shape index: {}]   ;;  %s1045_s3 = inlined_call_operand.vmem [shape: f32[4,1], index: 3, kind: input, shape index: {}]   ;;  %s1046_s4 = inlined_call_operand.vmem [shape: f32[4,4], index: 4, kind: input, shape index: {}]   ;;  %s1047_s5 = inlined_call_operand.vmem [shape: f32[4,1], index: 5, kind: input, shape index: {}]   ;;  %s1048_s6 = inlined_call_operand.hbm [shape: f32[2,4,256], index: 6, kind: output, shape index: {}]  }
   0x1   :  { %13 = vsyncpa [#allocation3 + $0x1], 0 }
   0x2   :  { %14 = vsyncpa [#allocation6], 0 }
   0x3   :  { %16 = vsyncpa [#allocation6 + $0x1], 0 }
   0x4   :  { %17 = vsyncpa [#allocation4], 0 }
   0x5   :  { %19 = vsyncpa [#allocation4 + $0x1], 0  ;;  %s886_s21 = smov 0   ;;  %s888_s22 = smov 0  }
   0x6   :  { %s890_s23 = smov 0   ;;  %s892_s24 = smov 0  }
   0x7   :  { %s894_s25 = smov 0   ;;  %s896_s26 = smov 0  }
   0x8 LB: > { %1051 = sst [smem:[#allocation11_spill]] %s844_s25  ;;  %s599_s27 = sadd.s32 4294967295, %s848_s26   ;;  %s848_s26 = sphi %s896_s26, %s25_s26   ;;  %s844_s25 = sphi %s894_s25, %s1060_s25   ;;  %s840_s24 = sphi %s892_s24, %s1059_s24   ;;  %s836_s23 = sphi %s890_s23, %s1063_s23   ;;  %s832_s22 = sphi %s888_s22, %s1062_s22   ;;  %s828_s21 = sphi %s886_s21, %s1061_s21  }
   0x9   : > { %s600_s28 = sadd.s32 4294967294, %s848_s26   ;;  %s37_s29 = sadd.s32 1, %s844_s25 }
   0xa   : > { %s46_s30 = sadd.s32 1, %s836_s23  ;;  %p39_p0 = scmp.ge.s32.totalorder %s37_s29, 2 }
   0xb   : > { %p53_p1 = scmp.ne.s32.totalorder %s836_s23, %s832_s22  ;;  %p54_p2 = scmp.eq.s32.totalorder %s848_s26, 0 }
   0xc   : > { %p59_p3 = scmp.ne.s32.totalorder %s832_s22, %s828_s21  ;;  %s1065_s29 = smov (%p39_p0, %s37_s29), 0 }
   0xd   : > { %1052 = sst [smem:[#allocation12_spill]] %s1065_s29  ;;  %p927_p4 = por %p54_p2, %p53_p1 }
   0xe   : > { %p60_p5 = scmp.eq.s32.totalorder %s599_s27, 0  ;;  %s41_s8 = ssub.s32 %s844_s25, %s1065_s29 }
   0xf   : > { %p197_p6 = scmp.eq.s32.totalorder %s599_s27, 1  ;;  %p44_p7 = scmp.eq.s32.totalorder %s41_s8, 0 }
  0x10   : > { %p933_p8 = por %p60_p5, %p59_p3  ;;  %p203_p10 = scmp.eq.s32.totalorder %s600_s28, 1 }
  0x11   : > { %p937_p9 = por %p197_p6, %p53_p1  ;;  %p602_p12 = scmp.ge.s32.totalorder %s848_s26, 2 }
  0x12   : > { %s942_s11 = scalar_select %p44_p7, %s836_s23, %s46_s30  }
  0x13   : > { %p944_p11 = por %p203_p10, %p59_p3  ;;  %p646_p13 = scmp.lt.s32.totalorder %s848_s26, 2 }
  0x14   : > { %1056 = sst [smem:[#allocation13_spill]] %s942_s11  ;;  %s235_s13 = sand.u32 1, %s836_s23  }
  0x15   : > { %s603_s14 = sshll.u32 %s235_s13, 3  ;;  %s626_s15 = sshll.u32 %s844_s25, 3 }
  0x16   : > { %s246_s18 = scalar_lea.hbm %s1042_s0, %s626_s15  ;;  %s239_s19 = scalar_lea.vmem [#allocation2], %s603_s14 }
  0x17   : > { %s250_s20 = sshll.u32 %s239_s19, 4  ;;  %s248_s27 = sshll.u32 %s246_s18, 4  ;;  %s251_s20 = int_to_ptr.vmem [resolvable:$true] %s250_s20  ;;  %s249_s27 = int_to_ptr.hbm [resolvable:$true] %s248_s27 }
  0x18   : > { %p636_p0 = pnand %p646_p13, %p927_p4  ;;  %p609_p1 = scmp.ge.s32.totalorder %s848_s26, 1 }
  0x19   : > { %p277_p2 = scmp.lt.s32.totalorder %s848_s26, 3  ;;  %s236_s28 = scalar_lea.sflag [#allocation3], %s235_s13 }
  0x1a   : > { %638 = dma.hbm_to_vmem [thread:$0]  (!%p636_p0), %s249_s27, 128, %s251_s20, %s236_s28  }
  0x1b   : > { %p278_p3 = pnand %p609_p1, %p277_p2  ;;  %s268_s29 = scalar_lea.hbm %s1043_s1, %s626_s15 }
  0x1c   : > { %s261_s25 = scalar_lea.vmem [#allocation5], %s603_s14  ;;  %s270_s16 = sshll.u32 %s268_s29, 4  ;;  %s271_s16 = int_to_ptr.hbm [resolvable:$true] %s270_s16 }
  0x1d   : > { %s272_s11 = sshll.u32 %s261_s25, 4  ;;  %s258_s17 = scalar_lea.sflag [#allocation6], %s235_s13  ;;  %s273_s11 = int_to_ptr.vmem [resolvable:$true] %s272_s11 }
  0x1e   : > { %641 = dma.hbm_to_vmem [thread:$0]  (!%p636_p0), %s271_s16, 128, %s273_s11, %s258_s17  }
  0x1f   : > { %281 = sbr.rel (%p278_p3) target bundleno = 336 (0x150), region = 44  ;;  %s963_s7 = sand.u32 (!%p278_p3), 1, %s832_s22  }
  0x20   : > { %s966_s18 = sshll.u32 (!%p278_p3), %s963_s7, 3  ;;  %s284_s19 = scalar_lea.sflag (!%p278_p3), [#allocation3], %s963_s7 }
  0x21   : > { %s287_s20 = scalar_lea.vmem (!%p278_p3), [#allocation2], %s966_s18 }
  0x24   : > { %815 = dma.done.wait (%p933_p8), %s284_s19, 128  }
  0x25   : > { %817 = vsyncadd (%p933_p8), %s284_s19, 4294967168  ;;  %s294_s25 = scalar_lea.sflag [#allocation6], %s963_s7  ;;  %s297_s29 = scalar_lea.vmem [#allocation5], %s966_s18 }
  0x26   : > { %819 = dma.done.wait (%p933_p8), %s294_s25, 128  }
  0x27   : > { %821 = vsyncadd (%p933_p8), %s294_s25, 4294967168  ;;  %v850_v0 = vmov 0   ;;  %v335_v1 = vld [vmem:[%s297_s29] sm:$0xff]  ;;  %vm351_vm0 = vcmask 1043456   ;;  %vm347_vm1 = vcmask 31744   ;;  %s628_s8 = sshll.u32 %s840_s24, 3 }
  0x28   : > { %697 = vset.pattern.permute.xlu0 %v850_v0  ;;  %v337_v2 = vld [vmem:[%s1045_s3] sm:$0xf]  ;;  %344 = vst [vmem:[#allocation1] ss:$2 sm:$0xff] %v335_v1  ;;  %s484_s19 = scalar_lea.hbm %s1048_s6, %s628_s8  ;;  %v462_v28 = vld [vmem:[%s287_s20] sm:$0xff]  ;;  %s331_s25 = scalar_lea.vmem [#allocation7], %s966_s18 }
  0x29   : > { %340 = vperm.xlu0 %697, %v337_v2   ;;  %v336_v3 = vld [vmem:[%s1044_s2] sm:$0xf]  ;;  %s486_s29 = sshll.u32 %s331_s25, 4  ;;  %s488_s11 = sshll.u32 %s484_s19, 4  ;;  %s487_s29 = int_to_ptr.vmem [resolvable:$true] %s486_s29  ;;  %s489_s11 = int_to_ptr.hbm [resolvable:$true] %s488_s11 }
  0x2a   : > { %v399_v4 = vld [vmem:[%s1047_s5] sm:$0xf]  ;;  %s471_s24 = scalar_lea.sflag [#allocation4], %s963_s7  ;;  %s776_s13 = sshra.s32 %s489_s11, 4  ;;  %s777_s13 = int_to_ptr.hbm [resolvable:$true] %s776_s13 }
  0x2b   : > { %v398_v14 = vld [vmem:[%s1046_s4] sm:$0xf]  ;;  %s778_s14 = scalar_lea.hbm %s777_s13, 8  ;;  %s782_s18 = scalar_lea.hbm %s1048_s6, 16 }
  0x2c   : > { %p779_p4 = scmp.ne.s32.totalorder %s777_s13, %s778_s14  ;;  %p783_p7 = scmp.lt.s32.totalorder %s777_s13, %s1048_s6 }
  0x2d   : > { %p784_p8 = scmp.lt.s32.totalorder %s782_s18, %s778_s14 }
  0x2e   : > { %p780_p5 = pnand %p779_p4, %p937_p9 }
  0x2f   : > { %v345_v5 = vld.sshfl [vmem:[#allocation1] sm:$0xff pattern:$0x75316420]  ;;  %v346_v6 = vld.sshfl [vmem:[#allocation1 + $0x8] sm:$0xff pattern:$0x75316420]  ;;  %p785_p10 = por %p784_p8, %p783_p7 }
  0x30   : > { %613 = vmatpush.msk.msra.mxu0 %vm351_vm0, %v345_v5  ;;  %615 = vmatpush.msk.msra.mxu1 %vm351_vm0, %v346_v6  ;;  %p781_p6 = pneg %p780_p5 }
  0x31   : > { %614 = vmatmul.msk.f32.vlgmr.msra.gmra.mxu0 %vm347_vm1, %v336_v3  ;;  %616 = vmatmul.msk.f32.vlgmr.msra.gmra.mxu1 %vm347_vm1, %v336_v3 }
  0x32   : > { %402 = vperm.xlu0 %697, %v399_v4   ;;  %p786_p13 = pnand %p785_p10, %p781_p6 }
  0x9b   : > { %v341_v7 = vpop.permute.xlu0 %340 }
  0xa4   : > { %v403_v15 = vpop.permute.xlu0 %402 }
  0xae   : > { %v373_v8 = vpop.f32.mrf.mxu0  ;;  %v393_v9 = vpop.f32.mrf.mxu1 }
  0xaf   : > { %v374_v10 = vadd.f32 %v373_v8, %v341_v7  ;;  %v394_v11 = vadd.f32 %v393_v9, %v341_v7 }
  0xb1   : > { %v396_v12 = vmax.f32 %v374_v10, 0.0  ;;  %v397_v13 = vmax.f32 %v394_v11, 0.0 }
  0xb3   : > { %617 = vmatpush.msk.msra.mxu2 %vm351_vm0, %v396_v12  ;;  %619 = vmatpush.msk.msra.mxu3 %vm351_vm0, %v397_v13 }
  0xb4   : > { %618 = vmatmul.msk.f32.vlgmr.msra.gmra.mxu2 %vm347_vm1, %v398_v14  ;;  %620 = vmatmul.msk.f32.vlgmr.msra.gmra.mxu3 %vm347_vm1, %v398_v14 }
 0x137   : > { %v431_v16 = vpop.f32.mrf.mxu2  ;;  %v451_v17 = vpop.f32.mrf.mxu3 }
 0x138   : > { %v432_v18 = vadd.f32 %v431_v16, %v403_v15  ;;  %v452_v19 = vadd.f32 %v451_v17, %v403_v15 }
 0x13a   : > { %v454_v20 = vmul.f32 0.5, %v432_v18  ;;  %v455_v21 = vmul.f32 0.5, %v452_v19 }
 0x13c   : > { %698 = vtanh.f32 %v454_v20 }
 0x13d   : > { %700 = vtanh.f32 %v455_v21 }
 0x142   : > { %v699_v22 = vpop.eup %698 }
 0x143   : > { %v701_v23 = vpop.eup %700  ;;  %v458_v24 = vmul.f32 0.5, %v699_v22 }
 0x144   : > { %v459_v25 = vmul.f32 0.5, %v701_v23 }
 0x145   : > { %v460_v27 = vadd.f32 0.5, %v458_v24 }
 0x146   : > { %v461_v26 = vadd.f32 0.5, %v459_v25 }
 0x148   : > { %v465_v29 = vrot.slane %v461_v26, 4 }
 0x14a   : > { %v466_v30 = vsel %vm351_vm0, %v460_v27, %v465_v29 }
 0x14b   : > { %v468_v31 = vmul.f32 %v466_v30, %v462_v28 }
 0x14d   : > { %469 = vst [vmem:[%s331_s25] sm:$0xff] %v468_v31 }
 0x14e   : > { %789 = shalt.err (!%p786_p13)
}
 0x14f   : > { %633 = dma.vmem_to_hbm [thread:$0]  (%p937_p9), %s487_s29, 128, %s489_s11, %s471_s24  }
 0x150 PF: > { %s500_s7 = sand.u32 1, %s828_s21   ;;  %p643_p0 = pnand %p602_p12, %p944_p11 }
 0x151   : > { %s501_s9 = scalar_lea.sflag [#allocation4], %s500_s7 }
 0x152   : > { %p644_p1 = pneg %p643_p0 }
 0x154   : > { %823 = dma.done.wait (%p644_p1), %s501_s9, 128  }
 0x155   : > { %825 = vsyncadd (%p644_p1), %s501_s9, 4294967168  ;;  %s25_s26 = sadd.s32 1, %s848_s26   ;;  %s1058_s30 = sld [smem:[#allocation13_spill]] }
 0x156   : > { %p22_p2 = scmp.ge.s32.totalorder %s25_s26, 4   ;;  %s1059_s24 = sld [smem:[#allocation11_spill]] }
 0x157   : > { %s1060_s25 = sld [smem:[#allocation12_spill]]  ;;  %s1061_s21 = smov %s832_s22 }
 0x158   : > { %s1062_s22 = smov %s836_s23  ;;  %24 = sbr.rel (!%p22_p2) target bundleno = 8 (0x8), region = 102 }
 0x15b   : > { %s1063_s23 = smov %s1058_s30 }
 0x15d   :  { %507 = vsyncpa [#allocation3], 1 }
 0x15e   :  { %509 = vsyncpa [#allocation3 + $0x1], 1 }
 0x15f   :  { %510 = vsyncpa [#allocation6], 1 }
 0x160   :  { %512 = vsyncpa [#allocation6 + $0x1], 1 }
 0x161   :  { %513 = vsyncpa [#allocation4], 1 }
 0x162   :  { %515 = vsyncpa [#allocation4 + $0x1], 1 }

</bundles_post_ra>
